<compile_context>
chip_gen: v5e
topology: v5e:2x2
jax: 0.10.0
libtpu: 0.0.40
codegen_flags: <defaults>
</compile_context>

<pallas_src>
import functools

import jax
import jax.numpy as jnp
from jax.experimental import pallas as pl
from jax.experimental.pallas import tpu as pltpu


_LANES = 128                                 # fast-path lane width (unmasked)
_FAST_MAX_BLOCK_BYTES = 4 * 1024 * 1024      # per-step input bytes (pre double-buffer)

_FB_LANES = 512                              # fallback lane width
_FB_MAX_TILE_ROWS = 512                      # fallback rows per grid step


def _round_up(x, m):
    return (x + m - 1) // m * m


# ----------------------------- fast path -----------------------------------

def _dice_fast_kernel(pred_ref, true_ref, out_ref, *, rows_per_chan):
    # pred_ref: (BT, 2*R, 128)  -- native (N,2,H,W) order, channel-0 rows first
    # true_ref: (BT, R, 128)
    # out_ref : (1, 2, 128)     -- per-block, per-channel lane-vector partials
    p = pred_ref[...]
    t = true_ref[...]
    r = rows_per_chan
    d0 = p[:, :r, :] - t              # pred[:, 0] - true
    d1 = p[:, r:, :] - (1.0 - t)      # pred[:, 1] - (1 - true)
    out_ref[0, 0] = jnp.sum(d0 * d0, axis=(0, 1))
    out_ref[0, 1] = jnp.sum(d1 * d1, axis=(0, 1))


def _dice_sums_fast(pred, true, n, hw):
    r = hw // _LANES
    pred_r = pred.reshape(n, 2 * r, _LANES)   # free: contiguous reshape, no copy
    true_r = true.reshape(n, r, _LANES)       # free: contiguous reshape, no copy

    # Largest batch tile that divides N and keeps the per-step input block
    # under the cap (x2 for double buffering still well inside scoped VMEM).
    bytes_per_batch = 3 * hw * 4
    max_b = max(1, _FAST_MAX_BLOCK_BYTES // bytes_per_batch)
    b_tile = 1
    for d in range(min(n, max_b), 0, -1):
        if n % d == 0:
            b_tile = d
            break
    num_blocks = n // b_tile

    kernel = functools.partial(_dice_fast_kernel, rows_per_chan=r)
    partials = pl.pallas_call(
        kernel,
        out_shape=jax.ShapeDtypeStruct((num_blocks, 2, _LANES), jnp.float32),
        grid_spec=pltpu.PrefetchScalarGridSpec(
            num_scalar_prefetch=0,
            grid=(num_blocks,),
            in_specs=[
                pl.BlockSpec((b_tile, 2 * r, _LANES), lambda i: (i, 0, 0)),
                pl.BlockSpec((b_tile, r, _LANES), lambda i: (i, 0, 0)),
            ],
            out_specs=pl.BlockSpec((1, 2, _LANES), lambda i: (i, 0, 0)),
        ),
        compiler_params=pltpu.CompilerParams(
            dimension_semantics=("parallel",),       # megacore-shardable on v7x
            vmem_limit_bytes=32 * 1024 * 1024,       # safe on v5e/v6e/v7x
        ),
    )(pred_r, true_r)
    return jnp.sum(partials, axis=(0, 2))            # (2,) sums of squares


# ------------------------ general fallback path -----------------------------

def _dice_fb_kernel(p0_ref, p1_ref, t_ref, out_ref):
    # p0_ref, p1_ref, t_ref : (TILE_R, _FB_LANES) VMEM blocks (f32)
    # out_ref               : (1, 2, 8, _FB_LANES) per-block partial sums of squares
    p0 = p0_ref[...]
    p1 = p1_ref[...]
    t = t_ref[...]

    d0 = p0 - t              # pred[:, 0] - true
    d1 = p1 - (1.0 - t)      # pred[:, 1] - (1 - true)

    tile_r, lanes = p0.shape
    r = tile_r // 8
    # Fold rows into the (8, lanes) vreg footprint: splitting only the leading
    # dim is layout-preserving, and the axis-0 sum is pure VPU vreg adds.
    out_ref[0, 0] = (d0 * d0).reshape(r, 8, lanes).sum(axis=0)
    out_ref[0, 1] = (d1 * d1).reshape(r, 8, lanes).sum(axis=0)


def _dice_sums_padded(pred, true, n, hw):
    total = n * hw
    p0 = pred[:, 0].reshape(-1)
    p1 = pred[:, 1].reshape(-1)
    t = true.reshape(-1)

    rows = _round_up(total, _FB_LANES) // _FB_LANES
    tile_rows = min(_FB_MAX_TILE_ROWS, _round_up(rows, 8))
    rows_padded = _round_up(rows, tile_rows)
    pad = rows_padded * _FB_LANES - total
    num_blocks = rows_padded // tile_rows

    # Padding contributes 0 to both sums: d0 = 0 - 0, d1 = 1 - (1 - 0).
    p0 = jnp.pad(p0, (0, pad)).reshape(rows_padded, _FB_LANES)
    p1 = jnp.pad(p1, (0, pad), constant_values=1.0).reshape(rows_padded, _FB_LANES)
    t = jnp.pad(t, (0, pad)).reshape(rows_padded, _FB_LANES)

    partials = pl.pallas_call(
        _dice_fb_kernel,
        out_shape=jax.ShapeDtypeStruct((num_blocks, 2, 8, _FB_LANES), jnp.float32),
        grid_spec=pltpu.PrefetchScalarGridSpec(
            num_scalar_prefetch=0,
            grid=(num_blocks,),
            in_specs=[
                pl.BlockSpec((tile_rows, _FB_LANES), lambda i: (i, 0)),
                pl.BlockSpec((tile_rows, _FB_LANES), lambda i: (i, 0)),
                pl.BlockSpec((tile_rows, _FB_LANES), lambda i: (i, 0)),
            ],
            out_specs=pl.BlockSpec((1, 2, 8, _FB_LANES), lambda i: (i, 0, 0, 0)),
        ),
        compiler_params=pltpu.CompilerParams(
            dimension_semantics=("parallel",),
            vmem_limit_bytes=32 * 1024 * 1024,
        ),
    )(p0, p1, t)
    return jnp.sum(partials, axis=(0, 2, 3))          # (2,) sums of squares


# --------------------------------- API ---------------------------------------

def dice_loss(pred, true):
    """pred: (N, 2, H, W); true: (N, 1, H, W) or (N, H, W).  Returns scalar."""
    pred = pred.astype(jnp.float32)
    if true.ndim == 4:
        true = jnp.squeeze(true, axis=1)   # explicit axis: safe when N == 1
    true = true.astype(jnp.float32)

    n, c, h, w = pred.shape
    assert c == 2 and true.shape == (n, h, w)
    hw = h * w

    if hw % _LANES == 0:
        sums = _dice_sums_fast(pred, true, n, hw)     # zero-copy path
    else:
        sums = _dice_sums_padded(pred, true, n, hw)   # general padded path

    return jnp.sqrt(sums[0]) + jnp.sqrt(sums[1])
    # TODO(synk): optional bf16 input narrowing (biggest lever on v5e HBM BW)
    # is skipped to keep exact f32 parity with the PyTorch reference.


if __name__ == "__main__":
    key = jax.random.PRNGKey(0)
    k1, k2 = jax.random.split(key)
    N, H, W = 2, 16, 16
    pred = jax.random.normal(k1, (N, 2, H, W), dtype=jnp.float32)
    true = (jax.random.uniform(k2, (N, 1, H, W)) > 0.5).astype(jnp.float32)

    loss = jax.block_until_ready(jax.jit(dice_loss)(pred, true))

    # pure-JAX reference check
    t = jnp.squeeze(true, axis=1)
    ref = (jnp.sqrt(jnp.sum((pred[:, 0] - t) ** 2))
           + jnp.sqrt(jnp.sum((pred[:, 1] - (1.0 - t)) ** 2)))
    assert jnp.allclose(loss, ref, rtol=1e-5, atol=1e-5), (loss, ref)

    print("KERNEL_OK")
</pallas_src>

<mosaic_0001>
module attributes {stable_mosaic.version = 11 : i64} {
  func.func @_dice_fast_kernel(%arg0: i32, %arg1: memref<2x4x128xf32, #tpu.memory_space<vmem>>, %arg2: memref<2x2x128xf32, #tpu.memory_space<vmem>>, %arg3: memref<1x2x128xf32, #tpu.memory_space<vmem>>) attributes {dimension_semantics = [#tpu.dimension_semantics<parallel>], iteration_bounds = array<i64: 1>, scalar_prefetch = 0 : i64, scratch_operands = 0 : i64, tpu.core_type = #tpu.core_type<tc>, window_params = [{transform_indices = @transform_0, window_bounds = array<i64: 2, 4, 128>}, {transform_indices = @transform_1, window_bounds = array<i64: 2, 2, 128>}, {transform_indices = @transform_2, window_bounds = array<i64: 1, 2, 128>}]} {
    %c0 = arith.constant 0 : index
    %c0_0 = arith.constant 0 : index
    %c0_1 = arith.constant 0 : index
    %0 = vector.load %arg1[%c0, %c0_0, %c0_1] : memref<2x4x128xf32, #tpu.memory_space<vmem>>, vector<2x4x128xf32>
    %c0_2 = arith.constant 0 : index
    %c0_3 = arith.constant 0 : index
    %c0_4 = arith.constant 0 : index
    %1 = vector.load %arg2[%c0_2, %c0_3, %c0_4] : memref<2x2x128xf32, #tpu.memory_space<vmem>>, vector<2x2x128xf32>
    %2 = vector.extract_strided_slice %0 {offsets = [0, 0, 0], sizes = [2, 2, 128], strides = [1, 1, 1]} : vector<2x4x128xf32> to vector<2x2x128xf32>
    %3 = arith.subf %2, %1 : vector<2x2x128xf32>
    %4 = vector.extract_strided_slice %0 {offsets = [0, 2, 0], sizes = [2, 2, 128], strides = [1, 1, 1]} : vector<2x4x128xf32> to vector<2x2x128xf32>
    %cst = arith.constant 1.000000e+00 : f32
    %5 = vector.broadcast %cst : f32 to vector<2x2x128xf32>
    %6 = arith.subf %5, %1 : vector<2x2x128xf32>
    %7 = arith.subf %4, %6 : vector<2x2x128xf32>
    %8 = arith.mulf %3, %3 : vector<2x2x128xf32>
    %cst_5 = arith.constant dense<0.000000e+00> : vector<128xf32>
    %9 = vector.multi_reduction <add>, %8, %cst_5 [0, 1] : vector<2x2x128xf32> to vector<128xf32>
    %c0_6 = arith.constant 0 : index
    %c0_7 = arith.constant 0 : index
    %c0_8 = arith.constant 0 : index
    %10 = vector.load %arg3[%c0_6, %c0_7, %c0_8] : memref<1x2x128xf32, #tpu.memory_space<vmem>>, vector<1x1x128xf32>
    %11 = vector.shape_cast %10 : vector<1x1x128xf32> to vector<128xf32>
    %12 = vector.shape_cast %9 : vector<128xf32> to vector<1x1x128xf32>
    tpu.vector_store %arg3[%c0_6, %c0_7, %c0_8], %12 {strides = array<i32>} : memref<1x2x128xf32, #tpu.memory_space<vmem>>, vector<1x1x128xf32>,
    %13 = arith.mulf %7, %7 : vector<2x2x128xf32>
    %cst_9 = arith.constant dense<0.000000e+00> : vector<128xf32>
    %14 = vector.multi_reduction <add>, %13, %cst_9 [0, 1] : vector<2x2x128xf32> to vector<128xf32>
    %c0_10 = arith.constant 0 : index
    %c1 = arith.constant 1 : index
    %c0_11 = arith.constant 0 : index
    %15 = vector.load %arg3[%c0_10, %c1, %c0_11] : memref<1x2x128xf32, #tpu.memory_space<vmem>>, vector<1x1x128xf32>
    %16 = vector.shape_cast %15 : vector<1x1x128xf32> to vector<128xf32>
    %17 = vector.shape_cast %14 : vector<128xf32> to vector<1x1x128xf32>
    tpu.vector_store %arg3[%c0_10, %c1, %c0_11], %17 {strides = array<i32>} : memref<1x2x128xf32, #tpu.memory_space<vmem>>, vector<1x1x128xf32>,
    return
  }
  func.func @transform_0(%arg0: i32) -> (i32, i32, i32) {
    %c0_i32 = arith.constant 0 : i32
    %c0_i32_0 = arith.constant 0 : i32
    %c0_i32_1 = arith.constant 0 : i32
    return %arg0, %c0_i32, %c0_i32_0 : i32, i32, i32
  }
  func.func @transform_1(%arg0: i32) -> (i32, i32, i32) {
    %c0_i32 = arith.constant 0 : i32
    %c0_i32_0 = arith.constant 0 : i32
    %c0_i32_1 = arith.constant 0 : i32
    return %arg0, %c0_i32, %c0_i32_0 : i32, i32, i32
  }
  func.func @transform_2(%arg0: i32) -> (i32, i32, i32) {
    %c0_i32 = arith.constant 0 : i32
    %c0_i32_0 = arith.constant 0 : i32
    %c0_i32_1 = arith.constant 0 : i32
    return %arg0, %c0_i32, %c0_i32_0 : i32, i32, i32
  }
}

</mosaic_0001>

<bundles_post_ra>
// kernel: squeeze.3
= control target key start
LH: loop header
LB: loop body
LE: loop exit
PB: predicated region body
PF: predicated region fallthrough
CT: control target
= control target key end

     0   :  { %2 = vsyncpa [#allocation1], 0  ;;  %s123_s8 = smov [#allocation0]   ;;  %s150_s0 = inlined_call_operand.hbm [shape: f32[2,1,16,16], index: 0, kind: input, shape index: {}]   ;;  %s151_s1 = inlined_call_operand.vmem [shape: f32[2,2,128], index: 1, kind: output, shape index: {}]  }
   0x1   :  { %s6_s0 = sshll.u32 %s150_s0, 4  ;;  %s8_s9 = sshll.u32 %s123_s8, 4  ;;  %s7_s0 = int_to_ptr.hbm [resolvable:$true] %s6_s0  ;;  %s9_s9 = int_to_ptr.vmem [resolvable:$true] %s8_s9 }
   0x2   :  { %11 = dma.hbm_to_vmem [thread:$0]  %s7_s0, 512, %s9_s9, [#allocation1]  }
   0x3   :  { %121 = dma.done.wait [#allocation1], 512  }
   0x4   :  { %122 = vsyncadd [#allocation1], 4294966784  ;;  %v20_v0 = vld [vmem:[#allocation0 + $0x7] ss:$8 sm:$0xf]   ;;  %s124_s10 = smov 112  }
   0x5   :  { %v36_v1 = vld [vmem:[#allocation0 + $0x5] ss:$8 sm:$0xf]   ;;  %21 = vrot.lane.b32.xlu0 %v20_v0, %s124_s10  ;;  %s125_s11 = smov 80   ;;  %s126_s12 = smov 48   ;;  %vm15_vm0 = vcmask 130048  }
   0x6   :  { %37 = vrot.lane.b32.xlu1 %v36_v1, %s125_s11  ;;  %v52_v2 = vld [vmem:[#allocation0 + $0x3] ss:$8 sm:$0xf]   ;;  %v28_v3 = vld [vmem:[#allocation0 + $0x6] ss:$8 sm:$0xf]  }
   0x7   :  { %53 = vrot.lane.b32.xlu2 %v52_v2, %s126_s12  ;;  %v44_v4 = vld [vmem:[#allocation0 + $0x4] ss:$8 sm:$0xf]   ;;  %v60_v5 = vld [vmem:[#allocation0 + $0x2] ss:$8 sm:$0xf]  }
   0x8   :  { %s127_s13 = smov 96   ;;  %s128_s14 = smov 64   ;;  %v68_v6 = vld [vmem:[#allocation0 + $0x1] ss:$8 sm:$0xf]   ;;  %vm23_vm1 = vcmask 1048448  }
   0x9   :  { %s129_s15 = smov 32   ;;  %s130_s16 = smov 16   ;;  %v14_v7 = vld [vmem:[#allocation0] ss:$8 sm:$0xf]   ;;  %vm31_vm2 = vcmask 917248  }
   0xa   :  { %16 = vst.msk [vmem:[#allocation2] sm:$0x3] %vm15_vm0, %v14_v7   ;;  %vm39_vm3 = vcmask 786048   ;;  %vm47_vm4 = vcmask 654848   ;;  %vm55_vm5 = vcmask 523648   ;;  %vm63_vm6 = vcmask 392448  }
   0xb   :  { %18 = vst.msk [vmem:[#allocation2 + $0x6] sm:$0xc] %vm15_vm0, %v14_v7   ;;  %vm71_vm7 = vcmask 261248  }
   0xd   :  { %29 = vrot.lane.b32.xlu0 %v28_v3, %s127_s13 }
   0xe   :  { %45 = vrot.lane.b32.xlu1 %v44_v4, %s128_s14 }
   0xf   :  { %61 = vrot.lane.b32.xlu2 %v60_v5, %s129_s15 }
  0x15   :  { %69 = vrot.lane.b32.xlu0 %v68_v6, %s130_s16 }
  0x61   :  { %v54_v8 = vpop.permute.xlu2 %53  }
  0x69   :  { %v62_v9 = vpop.permute.xlu2 %61  }
  0x77   :  { %v22_v10 = vpop.permute.xlu0 %21  }
  0x78   :  { %v38_v11 = vpop.permute.xlu1 %37   ;;  %24 = vst.msk [vmem:[#allocation2] sm:$0x3] %vm23_vm1, %v22_v10  }
  0x79   :  { %26 = vst.msk [vmem:[#allocation2 + $0x6] sm:$0xc] %vm23_vm1, %v22_v10  }
  0x7f   :  { %v30_v12 = vpop.permute.xlu0 %29  }
  0x80   :  { %v46_v13 = vpop.permute.xlu1 %45   ;;  %32 = vst.msk [vmem:[#allocation2] sm:$0x3] %vm31_vm2, %v30_v12  }
  0x81   :  { %34 = vst.msk [vmem:[#allocation2 + $0x6] sm:$0xc] %vm31_vm2, %v30_v12  }
  0x82   :  { %40 = vst.msk [vmem:[#allocation2] sm:$0x3] %vm39_vm3, %v38_v11  }
  0x83   :  { %42 = vst.msk [vmem:[#allocation2 + $0x6] sm:$0xc] %vm39_vm3, %v38_v11  }
  0x84   :  { %48 = vst.msk [vmem:[#allocation2] sm:$0x3] %vm47_vm4, %v46_v13  }
  0x85   :  { %50 = vst.msk [vmem:[#allocation2 + $0x6] sm:$0xc] %vm47_vm4, %v46_v13  }
  0x86   :  { %56 = vst.msk [vmem:[#allocation2] sm:$0x3] %vm55_vm5, %v54_v8  }
  0x87   :  { %58 = vst.msk [vmem:[#allocation2 + $0x6] sm:$0xc] %vm55_vm5, %v54_v8   ;;  %v70_v14 = vpop.permute.xlu0 %69  }
  0x88   :  { %64 = vst.msk [vmem:[#allocation2] sm:$0x3] %vm63_vm6, %v62_v9  }
  0x89   :  { %66 = vst.msk [vmem:[#allocation2 + $0x6] sm:$0xc] %vm63_vm6, %v62_v9  }
  0x8a   :  { %72 = vst.msk [vmem:[#allocation2] sm:$0x3] %vm71_vm7, %v70_v14  }
  0x8b   :  { %74 = vst.msk [vmem:[#allocation2 + $0x6] sm:$0xc] %vm71_vm7, %v70_v14  }
  0x91   :  { %v77_v15 = vld [vmem:[#allocation2] sm:$0x3] }
  0x92   :  { %80 = vst [vmem:[%s151_s1] sm:$0x3] %v77_v15  ;;  %v82_v16 = vld [vmem:[#allocation2 + $0x8] sm:$0x3] }
  0x93   :  { %88 = vst [vmem:[%s151_s1 + $0x2] sm:$0x3] %v82_v16 }
  0x94   :  { %87 = vsyncpa [#allocation1], 1 }

// kernel: dice_loss.1
= control target key start
LH: loop header
LB: loop body
LE: loop exit
PB: predicated region body
PF: predicated region fallthrough
CT: control target
= control target key end

     0   :  { %vm29_vm0 = vcmask 1041408   ;;  %s99_s0 = inlined_call_operand.vmem [shape: f32[2,4,128], index: 0, kind: input, shape index: {}]   ;;  %s100_s1 = inlined_call_operand.vmem [shape: f32[2,2,128], index: 1, kind: input, shape index: {}]   ;;  %s101_s2 = inlined_call_operand.vmem [shape: f32[1,2,128], index: 2, kind: output, shape index: {}]  }
   0x1   :  { %v11_v0 = vld [vmem:[%s99_s0] sm:$0xf]  ;;  %v12_v2 = vld [vmem:[%s99_s0 + $0x4] sm:$0xf] }
   0x2   :  { %v13_v1 = vld [vmem:[%s100_s1] sm:$0x3]  ;;  %v14_v3 = vld [vmem:[%s100_s1 + $0x2] sm:$0x3] }
   0x3   :  { %v15_v4 = vsub.f32 %v11_v0, %v13_v1  ;;  %v17_v5 = vsub.f32 1.0, %v13_v1  ;;  %v16_v6 = vsub.f32 %v12_v2, %v14_v3  ;;  %v18_v7 = vsub.f32 1.0, %v14_v3 }
   0x5   :  { %v27_v8 = vmul.f32 %v15_v4, %v15_v4  ;;  %v21_v9 = vrot.slane %v17_v5, 6  ;;  %v28_v10 = vmul.f32 %v16_v6, %v16_v6  ;;  %v22_v11 = vrot.slane %v18_v7, 6 }
   0x7   :  { %v30_v12 = vsel %vm29_vm0, %v27_v8, 0.0  ;;  %v25_v13 = vsub.f32 %v11_v0, %v21_v9  ;;  %v31_v14 = vsel %vm29_vm0, %v28_v10, 0.0  ;;  %v26_v15 = vsub.f32 %v12_v2, %v22_v11 }
   0x8   :  { %v32_v16 = vadd.f32 %v31_v14, %v30_v12 }
   0x9   :  { %v40_v17 = vmul.f32 %v25_v13, %v25_v13  ;;  %v41_v18 = vmul.f32 %v26_v15, %v26_v15 }
   0xa   :  { %v33_v19 = vrot.slane %v32_v16, 4 }
   0xb   :  { %v44_v20 = vrot.slane %v40_v17, 2  ;;  %v45_v21 = vrot.slane %v41_v18, 2 }
   0xc   :  { %v34_v22 = vadd.f32 %v33_v19, %v32_v16 }
   0xd   :  { %v48_v23 = vsel %vm29_vm0, %v44_v20, 0.0  ;;  %v49_v24 = vsel %vm29_vm0, %v45_v21, 0.0 }
   0xe   :  { %v35_v25 = vrot.slane %v34_v22, 2  ;;  %v50_v26 = vadd.f32 %v49_v24, %v48_v23 }
  0x10   :  { %v36_v27 = vadd.f32 %v35_v25, %v34_v22  ;;  %v51_v28 = vrot.slane %v50_v26, 4 }
  0x12   :  { %v37_v29 = vrot.slane %v36_v27, 1  ;;  %v52_v30 = vadd.f32 %v51_v28, %v50_v26 }
  0x14   :  { %v38_v31 = vadd.f32 %v37_v29, %v36_v27  ;;  %v53_v32 = vrot.slane %v52_v30, 2 }
  0x16   :  { %39 = vst [vmem:[%s101_s2] sm:$0x1] %v38_v31  ;;  %v54_v33 = vadd.f32 %v53_v32, %v52_v30 }
  0x18   :  { %v55_v34 = vrot.slane %v54_v33, 1 }
  0x1a   :  { %v56_v35 = vadd.f32 %v55_v34, %v54_v33 }
  0x1c   :  { %57 = vst [vmem:[%s101_s2 + $0x1] sm:$0x1] %v56_v35 }

</bundles_post_ra>
